<compile_context>
chip_gen: v7x
topology: tpu7x:2x2x1
jax: 0.10.0
libtpu: 0.0.40
codegen_flags: <defaults>
</compile_context>

<pallas_src>
import functools

import jax
import jax.numpy as jnp
from jax.experimental import pallas as pl
from jax.experimental.pallas import tpu as pltpu

MXU_DTYPE = jnp.bfloat16


def linear_2l_kernel(x_ref, w1_ref, bias_ref, w2_hbm, w3_hbm, o_ref,
                     w2_vmem, w3_vmem, sem):
    # Prefetch the two big weight operands from HBM into VMEM scratch so their
    # DMA overlaps the layer-1 / layer-2 compute.
    cp_w2 = pltpu.make_async_copy(w2_hbm, w2_vmem, sem.at[0])
    cp_w3 = pltpu.make_async_copy(w3_hbm, w3_vmem, sem.at[1])
    cp_w2.start()
    cp_w3.start()

    # layer 1: BatchNorm1 folded into w1; b1 folded into w1 via the ones-column
    # of the padded input, so the dot computes x @ W1 + b1 exactly.
    h = jnp.dot(x_ref[...], w1_ref[...], preferred_element_type=jnp.float32)
    h = jnp.maximum(h, 0.0)
    # TODO(synk): dropout(p=0.4) is identity in eval mode; train-mode stochastic
    # masking (pltpu.prng_*) not implemented.

    b = bias_ref[...]                       # (2, H) f32: row0 = b2, row1 = b3 (lane-padded)

    # layer 2: BatchNorm2 folded into w2/b2
    cp_w2.wait()
    h = jnp.dot(h.astype(w2_vmem.dtype), w2_vmem[...],
                preferred_element_type=jnp.float32)
    h = jnp.maximum(h + b[0:1, :], 0.0)

    # layer 3 + sigmoid (class dim padded to 128 lanes; sliced off wrapper-side)
    cp_w3.wait()
    kp = w3_vmem.shape[1]
    logits = jnp.dot(h.astype(w3_vmem.dtype), w3_vmem[...],
                     preferred_element_type=jnp.float32)
    o_ref[...] = jax.nn.sigmoid(logits + b[1:2, :kp])


def _full(shape):
    # full-array block (block_shape == array shape, no grid)
    return pl.BlockSpec(shape, lambda: (0,) * len(shape))


def prepare_params(params, *, eps=1e-5, mxu_dtype=MXU_DTYPE):
    """One-time parameter prep (run at load time, reuse for every forward):
    fold eval-mode BatchNorm into the linears, fold b1 into W1 via a
    ones-column, pad to lane-dense shapes, cast MXU operands to bf16."""
    C, H = params["w1"].shape
    K = params["w3"].shape[1]
    Cp = ((C + 1 + 127) // 128) * 128     # +1 column carries b1; 101 -> 128
    Kp = ((K + 127) // 128) * 128         # 43 -> 128

    # fold eval-mode BatchNorm into the preceding linear layers (in f32)
    s1 = params["gamma1"] * jax.lax.rsqrt(params["var1"] + eps)          # [1, H]
    w1 = params["w1"] * s1                                               # [C, H]
    b1 = (params["b1"] - params["mean1"]) * s1 + params["beta1"]         # [1, H]
    s2 = params["gamma2"] * jax.lax.rsqrt(params["var2"] + eps)
    w2 = params["w2"] * s2                                               # [H, H]
    b2 = (params["b2"] - params["mean2"]) * s2 + params["beta2"]         # [1, H]

    # b1 rides in row C of the padded W1 (matches the ones-column of x_p)
    w1_p = jnp.concatenate(
        [w1, b1, jnp.zeros((Cp - C - 1, H), jnp.float32)], axis=0)       # [Cp, H]

    # pad the class dim to exactly one lane tile
    w3_p = jnp.pad(params["w3"], ((0, 0), (0, Kp - K)))                  # [H, Kp]
    b3_p = jnp.pad(params["b3"], ((0, 0), (0, Kp - K)))                  # [1, Kp]

    # pack remaining biases into a single f32 buffer (fewer DMA descriptors)
    bias = jnp.concatenate(
        [b2, jnp.pad(b3_p, ((0, 0), (0, H - Kp)))], axis=0)              # [2, H]

    return {
        "w1": w1_p.astype(mxu_dtype),          # [Cp, H] bf16 (BN + b1 folded)
        "w2": w2.astype(mxu_dtype),            # [H, H]  bf16 (BN folded)
        "w3": w3_p.astype(mxu_dtype),          # [H, Kp] bf16
        "bias": bias.astype(jnp.float32),      # [2, H]  f32
        "n_features": C,
        "num_classes": K,
    }


@functools.partial(jax.jit, static_argnames=("num_classes",))
def _forward_impl(x, w1, w2, w3, bias, num_classes):
    B, C = x.shape
    Cp, H = w1.shape
    Kp = w3.shape[1]

    # pad x: real features | ones-column (carries folded b1) | zeros
    x_p = jnp.concatenate(
        [x, jnp.ones((B, 1), x.dtype), jnp.zeros((B, Cp - C - 1), x.dtype)],
        axis=1).astype(w1.dtype)

    flops = 2 * B * (Cp * H + H * H + H * Kp)
    bytes_accessed = ((x_p.size + w1.size + w2.size + w3.size) * 2
                      + (bias.size + B * Kp) * 4)

    out = pl.pallas_call(
        linear_2l_kernel,
        out_shape=jax.ShapeDtypeStruct((B, Kp), jnp.float32),
        in_specs=[
            _full((B, Cp)),                        # x (padded, bf16, ones-col)
            _full((Cp, H)),                        # w1 (BN + b1 folded, bf16)
            _full((2, H)),                         # packed biases b2|b3 (f32)
            pl.BlockSpec(memory_space=pl.ANY),     # w2: stays in HBM, manual DMA
            pl.BlockSpec(memory_space=pl.ANY),     # w3: stays in HBM, manual DMA
        ],
        out_specs=_full((B, Kp)),
        scratch_shapes=[
            pltpu.VMEM((H, H), w2.dtype),          # w2 VMEM landing buffer
            pltpu.VMEM((H, Kp), w3.dtype),         # w3 VMEM landing buffer
            pltpu.SemaphoreType.DMA((2,)),
        ],
        cost_estimate=pl.CostEstimate(
            flops=int(flops),
            transcendentals=int(B * Kp),
            bytes_accessed=int(bytes_accessed),
        ),
    )(x_p, w1, bias, w2, w3)

    # slice off padded (junk sigmoid(0)=0.5) class columns
    return out[:, :num_classes]


def linear_forward(x, prep):
    return _forward_impl(x, prep["w1"], prep["w2"], prep["w3"], prep["bias"],
                         num_classes=prep["num_classes"])


def init_params(key, n_components=100, hidden_size=512, num_classes=43):
    ks = jax.random.split(key, 14)
    lim1 = 1.0 / jnp.sqrt(n_components)
    lim2 = 1.0 / jnp.sqrt(hidden_size)
    params = {
        # linear_1: [in, out] layout
        "w1": jax.random.uniform(ks[0], (n_components, hidden_size), jnp.float32, -lim1, lim1),
        "b1": jax.random.uniform(ks[1], (1, hidden_size), jnp.float32, -lim1, lim1),
        # batch_norm_1 (non-trivial running stats so the fold is actually exercised)
        "gamma1": jax.random.uniform(ks[2], (1, hidden_size), jnp.float32, 0.5, 1.5),
        "beta1": 0.1 * jax.random.normal(ks[3], (1, hidden_size), jnp.float32),
        "mean1": 0.1 * jax.random.normal(ks[4], (1, hidden_size), jnp.float32),
        "var1": jax.random.uniform(ks[5], (1, hidden_size), jnp.float32, 0.5, 1.5),
        # linear_2
        "w2": jax.random.uniform(ks[6], (hidden_size, hidden_size), jnp.float32, -lim2, lim2),
        "b2": jax.random.uniform(ks[7], (1, hidden_size), jnp.float32, -lim2, lim2),
        # batch_norm_2
        "gamma2": jax.random.uniform(ks[8], (1, hidden_size), jnp.float32, 0.5, 1.5),
        "beta2": 0.1 * jax.random.normal(ks[9], (1, hidden_size), jnp.float32),
        "mean2": 0.1 * jax.random.normal(ks[10], (1, hidden_size), jnp.float32),
        "var2": jax.random.uniform(ks[11], (1, hidden_size), jnp.float32, 0.5, 1.5),
        # linear_3
        "w3": jax.random.uniform(ks[12], (hidden_size, num_classes), jnp.float32, -lim2, lim2),
        "b3": jax.random.uniform(ks[13], (1, num_classes), jnp.float32, -lim2, lim2),
    }
    return params


if __name__ == "__main__":
    key = jax.random.PRNGKey(0)
    kx, kp = jax.random.split(key)

    B, n_components, hidden_size, num_classes = 8, 100, 512, 43
    x = jax.random.normal(kx, (B, n_components), jnp.float32)
    params = init_params(kp, n_components, hidden_size, num_classes)

    # one-time prep (hoisted out of the per-call path)
    prep = jax.tree.map(jax.block_until_ready,
                        {k: v for k, v in prepare_params(params).items()
                         if k not in ("n_features", "num_classes")})
    prep["n_features"] = n_components
    prep["num_classes"] = num_classes

    out = jax.block_until_ready(linear_forward(x, prep))

    # reference: plain-JAX f32 eval-mode forward in the original (unfolded) form
    eps = 1e-5
    h = x @ params["w1"] + params["b1"]
    h = (h - params["mean1"]) * jax.lax.rsqrt(params["var1"] + eps) * params["gamma1"] + params["beta1"]
    h = jnp.maximum(h, 0.0)
    h = h @ params["w2"] + params["b2"]
    h = (h - params["mean2"]) * jax.lax.rsqrt(params["var2"] + eps) * params["gamma2"] + params["beta2"]
    h = jnp.maximum(h, 0.0)
    ref = jax.nn.sigmoid(h @ params["w3"] + params["b3"])

    assert out.shape == (B, num_classes)
    # bf16 MXU operands (incl. bf16-folded b1) -> loosened tolerance vs f32 ref
    assert jnp.max(jnp.abs(out - ref)) < 2e-2

    print("KERNEL_OK")
</pallas_src>

<mosaic_0001>
module attributes {stable_mosaic.version = 11 : i64} {
  func.func @linear_2l_kernel(%arg0: memref<8x128xbf16, #tpu.memory_space<vmem>>, %arg1: memref<128x512xbf16, #tpu.memory_space<vmem>>, %arg2: memref<2x512xf32, #tpu.memory_space<vmem>>, %arg3: memref<512x512xbf16, #tpu.memory_space<any>>, %arg4: memref<512x128xbf16, #tpu.memory_space<any>>, %arg5: memref<8x128xf32, #tpu.memory_space<vmem>>, %arg6: memref<512x512xbf16, #tpu.memory_space<vmem>>, %arg7: memref<512x128xbf16, #tpu.memory_space<vmem>>, %arg8: memref<2x!tpu.dma_semaphore, #tpu.memory_space<semaphore_mem>>) attributes {dimension_semantics = [], scalar_prefetch = 0 : i64, scratch_operands = 3 : i64, tpu.core_type = #tpu.core_type<tc>} {
    %c0_i32 = arith.constant 0 : i32
    %0 = tpu.memref_slice %arg8[%c0_i32] : memref<2x!tpu.dma_semaphore, #tpu.memory_space<semaphore_mem>> -> memref<1x!tpu.dma_semaphore, #tpu.memory_space<semaphore_mem>>
    %1 = tpu.memref_squeeze %0 : memref<1x!tpu.dma_semaphore, #tpu.memory_space<semaphore_mem>> -> memref<!tpu.dma_semaphore, #tpu.memory_space<semaphore_mem>>
    tpu.enqueue_dma source(%arg3 : memref<512x512xbf16, #tpu.memory_space<any>>) target(%arg6 : memref<512x512xbf16, #tpu.memory_space<vmem>>) target_semaphore(%1 : memref<!tpu.dma_semaphore, #tpu.memory_space<semaphore_mem>>)
    %c1_i32 = arith.constant 1 : i32
    %2 = tpu.memref_slice %arg8[%c1_i32] : memref<2x!tpu.dma_semaphore, #tpu.memory_space<semaphore_mem>> -> memref<1x!tpu.dma_semaphore, #tpu.memory_space<semaphore_mem>>
    %3 = tpu.memref_squeeze %2 : memref<1x!tpu.dma_semaphore, #tpu.memory_space<semaphore_mem>> -> memref<!tpu.dma_semaphore, #tpu.memory_space<semaphore_mem>>
    tpu.enqueue_dma source(%arg4 : memref<512x128xbf16, #tpu.memory_space<any>>) target(%arg7 : memref<512x128xbf16, #tpu.memory_space<vmem>>) target_semaphore(%3 : memref<!tpu.dma_semaphore, #tpu.memory_space<semaphore_mem>>)
    %c0 = arith.constant 0 : index
    %c0_0 = arith.constant 0 : index
    %4 = vector.load %arg0[%c0, %c0_0] : memref<8x128xbf16, #tpu.memory_space<vmem>>, vector<8x128xbf16>
    %c0_1 = arith.constant 0 : index
    %c0_2 = arith.constant 0 : index
    %5 = vector.load %arg1[%c0_1, %c0_2] : memref<128x512xbf16, #tpu.memory_space<vmem>>, vector<128x512xbf16>
    %cst = arith.constant dense<0.000000e+00> : vector<8x512xf32>
    %6 = tpu.matmul %4, %5, %cst {dimension_numbers = #tpu.dot_dimension_numbers<[1], [0], [0], [1], [0, 0, 1, 1], [], []>} : vector<8x128xbf16>, vector<128x512xbf16>, vector<8x512xf32> -> vector<8x512xf32>
    %cst_3 = arith.constant 0.000000e+00 : f32
    %7 = vector.broadcast %cst_3 : f32 to vector<8x512xf32>
    %8 = arith.maximumf %6, %7 : vector<8x512xf32>
    %c0_4 = arith.constant 0 : index
    %c0_5 = arith.constant 0 : index
    %9 = vector.load %arg2[%c0_4, %c0_5] : memref<2x512xf32, #tpu.memory_space<vmem>>, vector<2x512xf32>
    %c0_i32_6 = arith.constant 0 : i32
    %10 = tpu.memref_slice %arg8[%c0_i32_6] : memref<2x!tpu.dma_semaphore, #tpu.memory_space<semaphore_mem>> -> memref<1x!tpu.dma_semaphore, #tpu.memory_space<semaphore_mem>>
    %11 = tpu.memref_squeeze %10 : memref<1x!tpu.dma_semaphore, #tpu.memory_space<semaphore_mem>> -> memref<!tpu.dma_semaphore, #tpu.memory_space<semaphore_mem>>
    tpu.wait_dma2 semaphore(%11 : memref<!tpu.dma_semaphore, #tpu.memory_space<semaphore_mem>>) src(%arg3 : memref<512x512xbf16, #tpu.memory_space<any>>) dst(%arg6 : memref<512x512xbf16, #tpu.memory_space<vmem>>)
    %12 = arith.truncf %8 : vector<8x512xf32> to vector<8x512xbf16>
    %c0_7 = arith.constant 0 : index
    %c0_8 = arith.constant 0 : index
    %13 = vector.load %arg6[%c0_7, %c0_8] : memref<512x512xbf16, #tpu.memory_space<vmem>>, vector<512x512xbf16>
    %cst_9 = arith.constant dense<0.000000e+00> : vector<8x512xf32>
    %14 = tpu.matmul %12, %13, %cst_9 {dimension_numbers = #tpu.dot_dimension_numbers<[1], [0], [0], [1], [0, 0, 1, 1], [], []>} : vector<8x512xbf16>, vector<512x512xbf16>, vector<8x512xf32> -> vector<8x512xf32>
    %15 = vector.extract_strided_slice %9 {offsets = [0, 0], sizes = [1, 512], strides = [1, 1]} : vector<2x512xf32> to vector<1x512xf32>
    %16 = vector.broadcast %15 : vector<1x512xf32> to vector<8x512xf32>
    %17 = arith.addf %14, %16 : vector<8x512xf32>
    %cst_10 = arith.constant 0.000000e+00 : f32
    %18 = vector.broadcast %cst_10 : f32 to vector<8x512xf32>
    %19 = arith.maximumf %17, %18 : vector<8x512xf32>
    %c1_i32_11 = arith.constant 1 : i32
    %20 = tpu.memref_slice %arg8[%c1_i32_11] : memref<2x!tpu.dma_semaphore, #tpu.memory_space<semaphore_mem>> -> memref<1x!tpu.dma_semaphore, #tpu.memory_space<semaphore_mem>>
    %21 = tpu.memref_squeeze %20 : memref<1x!tpu.dma_semaphore, #tpu.memory_space<semaphore_mem>> -> memref<!tpu.dma_semaphore, #tpu.memory_space<semaphore_mem>>
    tpu.wait_dma2 semaphore(%21 : memref<!tpu.dma_semaphore, #tpu.memory_space<semaphore_mem>>) src(%arg4 : memref<512x128xbf16, #tpu.memory_space<any>>) dst(%arg7 : memref<512x128xbf16, #tpu.memory_space<vmem>>)
    %22 = arith.truncf %19 : vector<8x512xf32> to vector<8x512xbf16>
    %c0_12 = arith.constant 0 : index
    %c0_13 = arith.constant 0 : index
    %23 = vector.load %arg7[%c0_12, %c0_13] : memref<512x128xbf16, #tpu.memory_space<vmem>>, vector<512x128xbf16>
    %cst_14 = arith.constant dense<0.000000e+00> : vector<8x128xf32>
    %24 = tpu.matmul %22, %23, %cst_14 {dimension_numbers = #tpu.dot_dimension_numbers<[1], [0], [0], [1], [0, 0, 1, 1], [], []>} : vector<8x512xbf16>, vector<512x128xbf16>, vector<8x128xf32> -> vector<8x128xf32>
    %25 = vector.extract_strided_slice %9 {offsets = [1, 0], sizes = [1, 128], strides = [1, 1]} : vector<2x512xf32> to vector<1x128xf32>
    %26 = vector.broadcast %25 : vector<1x128xf32> to vector<8x128xf32>
    %27 = arith.addf %24, %26 : vector<8x128xf32>
    %28 = arith.negf %27 : vector<8x128xf32>
    %29 = math.exp %28 : vector<8x128xf32>
    %cst_15 = arith.constant 1.000000e+00 : f32
    %30 = vector.broadcast %cst_15 : f32 to vector<8x128xf32>
    %31 = arith.addf %30, %29 : vector<8x128xf32>
    %32 = arith.divf %30, %31 : vector<8x128xf32>
    %c0_16 = arith.constant 0 : index
    %c0_17 = arith.constant 0 : index
    %33 = vector.load %arg5[%c0_16, %c0_17] : memref<8x128xf32, #tpu.memory_space<vmem>>, vector<8x128xf32>
    tpu.vector_store %arg5[%c0_16, %c0_17], %32 {strides = array<i32>} : memref<8x128xf32, #tpu.memory_space<vmem>>, vector<8x128xf32>,
    return
  }
}

</mosaic_0001>

<bundles_post_ra>
// kernel: _forward_impl.1
= control target key start
LH: loop header
LB: loop body
LE: loop exit
PB: predicated region body
PF: predicated region fallthrough
CT: control target
= control target key end

     0   :  { %10 = vsyncpa [#allocation6], 0  ;;  %s1224_s0 = inlined_call_operand.vmem [shape: bf16[8,128], index: 0, kind: input, shape index: {}]   ;;  %s1225_s1 = inlined_call_operand.hbm [shape: bf16[128,512], index: 1, kind: input, shape index: {}]   ;;  %s1226_s2 = inlined_call_operand.vmem [shape: f32[2,512], index: 2, kind: input, shape index: {}]   ;;  %s1227_s3 = inlined_call_operand.hbm [shape: bf16[512,512], index: 3, kind: input, shape index: {}]   ;;  %s1228_s4 = inlined_call_operand.hbm [shape: bf16[512,128], index: 4, kind: input, shape index: {}]   ;;  %s1229_s5 = inlined_call_operand.hbm [shape: f32[8,128], index: 5, kind: output, shape index: {}]  }
   0x1   :  { %11 = vsyncpa [#allocation7], 0  ;;  %s1091_s18 = smov [#allocation5]   ;;  %s1017_s22 = scalar_lea.hbm %s1225_s1, 4096 }
   0x2   :  { %s19_s19 = sshll.u32 %s1091_s18, 4  ;;  %p1018_p0 = scmp.ne.s32.totalorder %s1225_s1, %s1017_s22  ;;  %s20_s19 = int_to_ptr.vmem [resolvable:$true] %s19_s19 }
   0x3   :  { %p1021_p1 = scmp.lt.u32.totalorder %s1017_s22, %s1225_s1 }
   0x5   :  { %p1023_p2 = pnand %p1021_p1, %p1018_p0 }
   0x7   :  { %1026 = shalt.err (!%p1023_p2)
}
   0x8   :  { %s1027_s27 = scalar_lea.vmem %s20_s19, 4096  ;;  %p1032_p4 = scmp.lt.s32.totalorder %s20_s19, %s20_s19 }
   0x9   :  { %p1028_p3 = scmp.ne.s32.totalorder %s20_s19, %s1027_s27  ;;  %p1033_p5 = scmp.lt.s32.totalorder %s1027_s27, %s1027_s27 }
   0xb   :  { %p1034_p6 = por %p1033_p5, %p1032_p4 }
   0xd   :  { %p1035_p7 = pnand %p1034_p6, %p1028_p3 }
   0xf   :  { %1038 = shalt.err (!%p1035_p7)
}
  0x10   :  { %s1092_s28 = smov 256   ;;  %s1093_s29 = smov 16  }
  0x11   :  { %25 = dma.hbm_to_vmem [thread:$0]  %s1225_s1, 4096, %s20_s19, [#allocation6], %s1092_s28, %s1092_s28, %s1093_s29  }
  0x12   :  { %1083 = dma.done.wait [#allocation6], 4096  }
  0x13   :  { %1084 = vsyncadd [#allocation6], 4294963200  ;;  %s36_s7 = sld [smem:[#allocation0]]   ;;  %s1094_s8 = smov 512   ;;  %v1095_v0 = vmov 0  }
  0x14   :  { %48 = sst [smem:[#allocation10]] %s1094_s8  ;;  %304 = vmatprep.mubr.bf16.mxu0 %v1095_v0  ;;  %345 = vmatprep.mubr.bf16.mxu1 %v1095_v0  ;;  %s1096_s9 = smov 4  }
  0x15   :  { %50 = sst [smem:[#allocation10 + $0x1]] %s1094_s8  ;;  %s1097_s10 = smov 64  }
  0x16   :  { %52 = sst [smem:[#allocation10 + $0x2]] %s1096_s9  ;;  %s1098_s11 = smov 128  }
  0x17   :  { %54 = sst [smem:[#allocation10 + $0x3]] %s1097_s10  ;;  %s1099_s12 = smov 2  }
  0x18   :  { %56 = sst [smem:[#allocation10 + $0x4]] %s1098_s11  ;;  %s1100_s13 = smov [#allocation2]  }
  0x19   :  { %58 = sst [smem:[#allocation10 + $0x5]] %s1099_s12  ;;  %s44_s14 = sshll.u32 %s1100_s13, 4  ;;  %s45_s14 = int_to_ptr.vmem [resolvable:$true] %s44_s14 }
  0x1a   :  { %s858_s1 = sshll.u32 %s36_s7, 26  ;;  %60 = sst [smem:[#allocation10 + $0x6]] %s1092_s28 }
  0x1b   :  { %s859_s15 = sadd.s32 134217728, %s858_s1  ;;  %62 = sst [smem:[#allocation10 + $0x7]] %s1097_s10 }
  0x1c   :  { %64 = sst [smem:[#allocation10 + $0x8]] %s1096_s9  ;;  %s1101_s16 = smov [#allocation4]  }
  0x1d   :  { %s1102_s17 = smov [#allocation9]   ;;  %s1103_s22 = smov [#allocation3]  }
  0x1e   :  { %66 = dma.general %s1227_s3, 16384, %s45_s14, %s1101_s16, %s1102_s17, [#allocation10], %s859_s15, 0  }
  0x1f   :  { %v1153_v1 = vld [vmem:[%s1226_s2] sm:$0xff]  ;;  %v967_v3 = vld [vmem:[#allocation5 + $0xc] ss:$16 sps:$4 sm:$0xff]   ;;  %v970_v5 = vld [vmem:[#allocation5 + $0x8] ss:$16 sps:$4 sm:$0xff]   ;;  %s75_s23 = sshll.u32 %s1103_s22, 4  ;;  %s76_s23 = int_to_ptr.vmem [resolvable:$true] %s75_s23 }
  0x20   :  { %v965_v2 = vld [vmem:[#allocation5 + $0x4] ss:$16 sps:$4 sm:$0xff]   ;;  %v969_v4 = vld [vmem:[#allocation5] ss:$16 sps:$4 sm:$0xff]   ;;  %313 = vmatprep.subr.bf16.mxu1 %v967_v3  ;;  %v973_v7 = vld [vmem:[#allocation5 + $0x2c] ss:$16 sps:$4 sm:$0xff]  }
  0x21   :  { %272 = vmatprep.subr.bf16.mxu0 %v965_v2  ;;  %v971_v6 = vld [vmem:[#allocation5 + $0x24] ss:$16 sps:$4 sm:$0xff]   ;;  %314 = vmatpush1.bf16.msra.mxu1 %v970_v5  ;;  %v975_v8 = vld [vmem:[#allocation5 + $0x20] ss:$16 sps:$4 sm:$0xff]   ;;  %v976_v9 = vld [vmem:[#allocation5 + $0x28] ss:$16 sps:$4 sm:$0xff]  }
  0x22   :  { %273 = vmatpush1.bf16.msra.mxu0 %v969_v4  ;;  %315 = vmatprep.subr.bf16.mxu1 %v973_v7  ;;  %v977_v10 = vld [vmem:[#allocation5 + $0x44] ss:$16 sps:$4 sm:$0xff]   ;;  %v979_v11 = vld [vmem:[#allocation5 + $0x4c] ss:$16 sps:$4 sm:$0xff]   ;;  %v981_v12 = vld [vmem:[#allocation5 + $0x40] ss:$16 sps:$4 sm:$0xff]  }
  0x23   :  { %274 = vmatprep.subr.bf16.mxu0 %v971_v6  ;;  %v982_v13 = vld [vmem:[#allocation5 + $0x48] ss:$16 sps:$4 sm:$0xff]   ;;  %v983_v14 = vld [vmem:[#allocation5 + $0x64] ss:$16 sps:$4 sm:$0xff]   ;;  %v985_v15 = vld [vmem:[#allocation5 + $0x6c] ss:$16 sps:$4 sm:$0xff]  }
  0x24   :  { %v987_v16 = vld [vmem:[#allocation5 + $0x60] ss:$16 sps:$4 sm:$0xff]   ;;  %v988_v17 = vld [vmem:[#allocation5 + $0x68] ss:$16 sps:$4 sm:$0xff]   ;;  %v989_v18 = vld [vmem:[#allocation5 + $0x84] ss:$16 sps:$4 sm:$0xff]  }
  0x25   :  { %316 = vmatpush1.bf16.msra.mxu1 %v976_v9  ;;  %v991_v19 = vld [vmem:[#allocation5 + $0x8c] ss:$16 sps:$4 sm:$0xff]   ;;  %v993_v20 = vld [vmem:[#allocation5 + $0x80] ss:$16 sps:$4 sm:$0xff]   ;;  %v994_v21 = vld [vmem:[#allocation5 + $0x88] ss:$16 sps:$4 sm:$0xff]  }
  0x26   :  { %275 = vmatpush1.bf16.msra.mxu0 %v975_v8  ;;  %317 = vmatprep.subr.bf16.mxu1 %v979_v11  ;;  %v995_v22 = vld [vmem:[#allocation5 + $0xa4] ss:$16 sps:$4 sm:$0xff]   ;;  %v997_v23 = vld [vmem:[#allocation5 + $0xac] ss:$16 sps:$4 sm:$0xff]   ;;  %v999_v24 = vld [vmem:[#allocation5 + $0xa0] ss:$16 sps:$4 sm:$0xff]  }
  0x27   :  { %276 = vmatprep.subr.bf16.mxu0 %v977_v10  ;;  %v1000_v25 = vld [vmem:[#allocation5 + $0xa8] ss:$16 sps:$4 sm:$0xff]   ;;  %v1001_v26 = vld [vmem:[#allocation5 + $0xc4] ss:$16 sps:$4 sm:$0xff]   ;;  %v1003_v27 = vld [vmem:[#allocation5 + $0xcc] ss:$16 sps:$4 sm:$0xff]  }
  0x28   :  { %v1005_v28 = vld [vmem:[#allocation5 + $0xc0] ss:$16 sps:$4 sm:$0xff]   ;;  %v1006_v29 = vld [vmem:[#allocation5 + $0xc8] ss:$16 sps:$4 sm:$0xff]   ;;  %v1007_v30 = vld [vmem:[#allocation5 + $0xe4] ss:$16 sps:$4 sm:$0xff]  }
  0x29   :  { %318 = vmatpush1.bf16.msra.mxu1 %v982_v13  ;;  %v1009_v31 = vld [vmem:[#allocation5 + $0xec] ss:$16 sps:$4 sm:$0xff]   ;;  %v1011_v32 = vld [vmem:[#allocation5 + $0xe0] ss:$16 sps:$4 sm:$0xff]   ;;  %v1012_v33 = vld [vmem:[#allocation5 + $0xe8] ss:$16 sps:$4 sm:$0xff]  }
  0x2a   :  { %277 = vmatpush1.bf16.msra.mxu0 %v981_v12  ;;  %319 = vmatprep.subr.bf16.mxu1 %v985_v15  ;;  %v79_v34 = vld [vmem:[%s1224_s0] sm:$0xf]  ;;  %s1039_s26 = scalar_lea.hbm %s1228_s4, 4096 }
  0x2b   :  { %278 = vmatprep.subr.bf16.mxu0 %v983_v14  ;;  %p1040_p8 = scmp.ne.s32.totalorder %s1228_s4, %s1039_s26  ;;  %p1043_p9 = scmp.lt.u32.totalorder %s1039_s26, %s1228_s4 }
  0x2d   :  { %320 = vmatpush1.bf16.msra.mxu1 %v988_v17  ;;  %p1045_p10 = pnand %p1043_p9, %p1040_p8 }
  0x2e   :  { %279 = vmatpush1.bf16.msra.mxu0 %v987_v16  ;;  %321 = vmatprep.subr.bf16.mxu1 %v991_v19 }
  0x2f   :  { %280 = vmatprep.subr.bf16.mxu0 %v989_v18 }
  0x31   :  { %322 = vmatpush1.bf16.msra.mxu1 %v994_v21 }
  0x32   :  { %281 = vmatpush1.bf16.msra.mxu0 %v993_v20  ;;  %323 = vmatprep.subr.bf16.mxu1 %v997_v23 }
  0x33   :  { %282 = vmatprep.subr.bf16.mxu0 %v995_v22 }
  0x35   :  { %324 = vmatpush1.bf16.msra.mxu1 %v1000_v25 }
  0x36   :  { %283 = vmatpush1.bf16.msra.mxu0 %v999_v24  ;;  %325 = vmatprep.subr.bf16.mxu1 %v1003_v27 }
  0x37   :  { %284 = vmatprep.subr.bf16.mxu0 %v1001_v26 }
  0x39   :  { %326 = vmatpush1.bf16.msra.mxu1 %v1006_v29 }
  0x3a   :  { %285 = vmatpush1.bf16.msra.mxu0 %v1005_v28  ;;  %327 = vmatprep.subr.bf16.mxu1 %v1009_v31 }
  0x3b   :  { %286 = vmatprep.subr.bf16.mxu0 %v1007_v30 }
  0x3d   :  { %328 = vmatpush1.bf16.msra.mxu1 %v1012_v33 }
  0x3e   :  { %287 = vmatpush1.bf16.msra.mxu0 %v1011_v32 }
  0x40   :  { %346 = vmatmul.mubr.bf16.vlgmr.msra.gmra.mrb[0].mxu1 %v79_v34 }
  0x41   :  { %305 = vmatmul.mubr.bf16.vlgmr.msra.gmra.mrb[0].mxu0 %v79_v34 }
  0x42   :  { %1048 = shalt.err (!%p1045_p10)  }
  0x43   :  { %s1049_s0 = scalar_lea.vmem %s76_s23, 4096  ;;  %p1054_p12 = scmp.lt.s32.totalorder %s76_s23, %s76_s23 }
  0x44   :  { %p1050_p11 = scmp.ne.s32.totalorder %s76_s23, %s1049_s0  ;;  %p1055_p13 = scmp.lt.s32.totalorder %s1049_s0, %s1049_s0 }
  0x46   :  { %p1056_p0 = por %p1055_p13, %p1054_p12 }
  0x48   :  { %p1057_p1 = pnand %p1056_p0, %p1050_p11 }
  0x4a   :  { %1060 = shalt.err (!%p1057_p1)  }
  0x4b   :  { %78 = dma.hbm_to_vmem [thread:$0]  %s1228_s4, 4096, %s76_s23, [#allocation4 + $0x1] }
 0x113   :  { %v1173_v37 = vpop.f32.mrb[0].mxu1 }
 0x114   :  { %v1170_v35 = vpop.f32.mrb[0].mxu0  ;;  %v356_v39 = vmax.f32 %v1173_v37, 0.0  ;;  %v1176_v41 = vpop.f32.mrb[1].mxu1 }
 0x115   :  { %v354_v36 = vmax.f32 %v1170_v35, 0.0  ;;  %v308_v38 = vpop.f32.mrb[1].mxu0  ;;  %v357_v43 = vmax.f32 %v1176_v41, 0.0  ;;  %v351_v44 = vpop.f32.mrb[2].mxu1 }
 0x116   :  { %v355_v40 = vmax.f32 %v308_v38, 0.0  ;;  %v310_v42 = vpop.f32.mrb[2].mxu0  ;;  %v352_v46 = vpop.f32.mrb[3].mxu1 }
 0x117   :  { %v311_v45 = vpop.f32.mrb[3].mxu0 }
 0x118   :  { %1085 = dma.done.wait [#allocation4], 16384 }
 0x119   :  { %1086 = vsyncadd [#allocation4], 4294950912  ;;  %v364_v47 = vpack.c.bf16 %v355_v40, %v355_v40  ;;  %v368_v48 = vld [vmem:[#allocation2 + $0x8] sm:$0xff]  ;;  %v370_v49 = vld [vmem:[#allocation2 + $0x18] sm:$0xff] }
 0x11a   :  { %v367_v50 = vld [vmem:[#allocation2] sm:$0xff]  ;;  %532 = vmatprep.subr.bf16.mxu0 %v368_v48  ;;  %614 = vmatprep.subr.bf16.mxu1 %v370_v49  ;;  %v369_v51 = vld [vmem:[#allocation2 + $0x10] sm:$0xff]  ;;  %v372_v52 = vld [vmem:[#allocation2 + $0x28] sm:$0xff] }
 0x11b   :  { %564 = vmatprep.mubr.bf16.mxu0 %v364_v47  ;;  %646 = vmatprep.mubr.bf16.mxu1 %v364_v47  ;;  %v374_v53 = vld [vmem:[#allocation2 + $0x38] sm:$0xff]  ;;  %v371_v54 = vld [vmem:[#allocation2 + $0x20] sm:$0xff]  ;;  %v373_v55 = vld [vmem:[#allocation2 + $0x30] sm:$0xff] }
 0x11c   :  { %533 = vmatpush1.bf16.msra.mxu0 %v367_v50  ;;  %615 = vmatpush1.bf16.msra.mxu1 %v369_v51  ;;  %v376_v56 = vld [vmem:[#allocation2 + $0x48] sm:$0xff]  ;;  %v378_v57 = vld [vmem:[#allocation2 + $0x58] sm:$0xff]  ;;  %v375_v58 = vld [vmem:[#allocation2 + $0x40] sm:$0xff] }
 0x11d   :  { %534 = vmatprep.subr.bf16.mxu0 %v372_v52  ;;  %616 = vmatprep.subr.bf16.mxu1 %v374_v53  ;;  %v377_v59 = vld [vmem:[#allocation2 + $0x50] sm:$0xff]  ;;  %v380_v60 = vld [vmem:[#allocation2 + $0x68] sm:$0xff]  ;;  %v382_v61 = vld [vmem:[#allocation2 + $0x78] sm:$0xff] }
 0x11e   :  { %v379_v62 = vld [vmem:[#allocation2 + $0x60] sm:$0xff]  ;;  %v381_v63 = vld [vmem:[#allocation2 + $0x70] sm:$0xff]  ;;  %v384_v0 = vld [vmem:[#allocation2 + $0x88] sm:$0xff] }
 0x11f   :  { %v386_v2 = vld [vmem:[#allocation2 + $0x98] sm:$0xff]  ;;  %v383_v3 = vld [vmem:[#allocation2 + $0x80] sm:$0xff]  ;;  %v385_v4 = vld [vmem:[#allocation2 + $0x90] sm:$0xff] }
 0x120   :  { %535 = vmatpush1.bf16.msra.mxu0 %v371_v54  ;;  %617 = vmatpush1.bf16.msra.mxu1 %v373_v55  ;;  %v388_v5 = vld [vmem:[#allocation2 + $0xa8] sm:$0xff]  ;;  %v390_v6 = vld [vmem:[#allocation2 + $0xb8] sm:$0xff]  ;;  %v387_v7 = vld [vmem:[#allocation2 + $0xa0] sm:$0xff] }
 0x121   :  { %536 = vmatprep.subr.bf16.mxu0 %v376_v56  ;;  %618 = vmatprep.subr.bf16.mxu1 %v378_v57  ;;  %v389_v8 = vld [vmem:[#allocation2 + $0xb0] sm:$0xff]  ;;  %v392_v9 = vld [vmem:[#allocation2 + $0xc8] sm:$0xff]  ;;  %v394_v10 = vld [vmem:[#allocation2 + $0xd8] sm:$0xff]  ;;  %v363_v57 = vpack.c.bf16 %v354_v36, %v354_v36 }
 0x122   :  { %v391_v11 = vld [vmem:[#allocation2 + $0xc0] sm:$0xff]  ;;  %v393_v12 = vld [vmem:[#allocation2 + $0xd0] sm:$0xff]  ;;  %v396_v13 = vld [vmem:[#allocation2 + $0xe8] sm:$0xff] }
 0x123   :  { %v398_v14 = vld [vmem:[#allocation2 + $0xf8] sm:$0xff]  ;;  %v395_v15 = vld [vmem:[#allocation2 + $0xe0] sm:$0xff]  ;;  %v397_v16 = vld [vmem:[#allocation2 + $0xf0] sm:$0xff] }
 0x124   :  { %537 = vmatpush1.bf16.msra.mxu0 %v375_v58  ;;  %619 = vmatpush1.bf16.msra.mxu1 %v377_v59  ;;  %v400_v17 = vld [vmem:[#allocation2 + $0x108] sm:$0xff]  ;;  %v402_v18 = vld [vmem:[#allocation2 + $0x118] sm:$0xff]  ;;  %v399_v19 = vld [vmem:[#allocation2 + $0x100] sm:$0xff] }
 0x125   :  { %538 = vmatprep.subr.bf16.mxu0 %v380_v60  ;;  %620 = vmatprep.subr.bf16.mxu1 %v382_v61  ;;  %v401_v20 = vld [vmem:[#allocation2 + $0x110] sm:$0xff]  ;;  %v404_v21 = vld [vmem:[#allocation2 + $0x128] sm:$0xff]  ;;  %v406_v22 = vld [vmem:[#allocation2 + $0x138] sm:$0xff] }
 0x126   :  { %v403_v23 = vld [vmem:[#allocation2 + $0x120] sm:$0xff]  ;;  %v405_v24 = vld [vmem:[#allocation2 + $0x130] sm:$0xff]  ;;  %v408_v25 = vld [vmem:[#allocation2 + $0x148] sm:$0xff] }
 0x127   :  { %v410_v26 = vld [vmem:[#allocation2 + $0x158] sm:$0xff]  ;;  %v407_v27 = vld [vmem:[#allocation2 + $0x140] sm:$0xff]  ;;  %v409_v28 = vld [vmem:[#allocation2 + $0x150] sm:$0xff] }
 0x128   :  { %539 = vmatpush1.bf16.msra.mxu0 %v379_v62  ;;  %621 = vmatpush1.bf16.msra.mxu1 %v381_v63  ;;  %v412_v29 = vld [vmem:[#allocation2 + $0x168] sm:$0xff]  ;;  %v414_v30 = vld [vmem:[#allocation2 + $0x178] sm:$0xff]  ;;  %v411_v31 = vld [vmem:[#allocation2 + $0x160] sm:$0xff]  ;;  %v366_v62 = vpack.c.bf16 %v357_v43, %v357_v43 }
 0x129   :  { %540 = vmatprep.subr.bf16.mxu0 %v384_v0  ;;  %622 = vmatprep.subr.bf16.mxu1 %v386_v2  ;;  %v413_v32 = vld [vmem:[#allocation2 + $0x170] sm:$0xff]  ;;  %v416_v33 = vld [vmem:[#allocation2 + $0x188] sm:$0xff]  ;;  %v418_v34 = vld [vmem:[#allocation2 + $0x198] sm:$0xff] }
 0x12a   :  { %v415_v38 = vld [vmem:[#allocation2 + $0x180] sm:$0xff]  ;;  %v417_v40 = vld [vmem:[#allocation2 + $0x190] sm:$0xff]  ;;  %v420_v42 = vld [vmem:[#allocation2 + $0x1a8] sm:$0xff] }
 0x12b   :  { %v422_v44 = vld [vmem:[#allocation2 + $0x1b8] sm:$0xff]  ;;  %v419_v45 = vld [vmem:[#allocation2 + $0x1a0] sm:$0xff]  ;;  %v421_v46 = vld [vmem:[#allocation2 + $0x1b0] sm:$0xff] }
 0x12c   :  { %541 = vmatpush1.bf16.msra.mxu0 %v383_v3  ;;  %623 = vmatpush1.bf16.msra.mxu1 %v385_v4  ;;  %v424_v47 = vld [vmem:[#allocation2 + $0x1c8] sm:$0xff]  ;;  %v426_v48 = vld [vmem:[#allocation2 + $0x1d8] sm:$0xff]  ;;  %v423_v49 = vld [vmem:[#allocation2 + $0x1c0] sm:$0xff] }
 0x12d   :  { %542 = vmatprep.subr.bf16.mxu0 %v388_v5  ;;  %624 = vmatprep.subr.bf16.mxu1 %v390_v6  ;;  %v425_v50 = vld [vmem:[#allocation2 + $0x1d0] sm:$0xff]  ;;  %v428_v51 = vld [vmem:[#allocation2 + $0x1e8] sm:$0xff]  ;;  %v430_v52 = vld [vmem:[#allocation2 + $0x1f8] sm:$0xff] }
 0x12e   :  { %v427_v53 = vld [vmem:[#allocation2 + $0x1e0] sm:$0xff]  ;;  %v429_v54 = vld [vmem:[#allocation2 + $0x1f0] sm:$0xff]  ;;  %v432_v55 = vld [vmem:[#allocation2 + $0x208] sm:$0xff] }
 0x12f   :  { %v434_v56 = vld [vmem:[#allocation2 + $0x218] sm:$0xff]  ;;  %v431_v58 = vld [vmem:[#allocation2 + $0x200] sm:$0xff]  ;;  %v433_v59 = vld [vmem:[#allocation2 + $0x210] sm:$0xff] }
 0x130   :  { %543 = vmatpush1.bf16.msra.mxu0 %v387_v7  ;;  %625 = vmatpush1.bf16.msra.mxu1 %v389_v8  ;;  %v436_v60 = vld [vmem:[#allocation2 + $0x228] sm:$0xff]  ;;  %v438_v61 = vld [vmem:[#allocation2 + $0x238] sm:$0xff]  ;;  %v435_v35 = vld [vmem:[#allocation2 + $0x220] sm:$0xff] }
 0x131   :  { %544 = vmatprep.subr.bf16.mxu0 %v392_v9  ;;  %626 = vmatprep.subr.bf16.mxu1 %v394_v10  ;;  %v437_v36 = vld [vmem:[#allocation2 + $0x230] sm:$0xff]  ;;  %v440_v63 = vld [vmem:[#allocation2 + $0x248] sm:$0xff]  ;;  %v442_v0 = vld [vmem:[#allocation2 + $0x258] sm:$0xff] }
 0x132   :  { %v439_v2 = vld [vmem:[#allocation2 + $0x240] sm:$0xff]  ;;  %v441_v41 = vld [vmem:[#allocation2 + $0x250] sm:$0xff]  ;;  %v444_v3 = vld [vmem:[#allocation2 + $0x268] sm:$0xff] }
 0x133   :  { %v446_v43 = vld [vmem:[#allocation2 + $0x278] sm:$0xff]  ;;  %v443_v4 = vld [vmem:[#allocation2 + $0x260] sm:$0xff]  ;;  %v445_v5 = vld [vmem:[#allocation2 + $0x270] sm:$0xff] }
 0x134   :  { %545 = vmatpush1.bf16.msra.mxu0 %v391_v11  ;;  %627 = vmatpush1.bf16.msra.mxu1 %v393_v12  ;;  %v448_v6 = vld [vmem:[#allocation2 + $0x288] sm:$0xff]  ;;  %v450_v7 = vld [vmem:[#allocation2 + $0x298] sm:$0xff]  ;;  %v447_v8 = vld [vmem:[#allocation2 + $0x280] sm:$0xff] }
 0x135   :  { %546 = vmatprep.subr.bf16.mxu0 %v396_v13  ;;  %628 = vmatprep.subr.bf16.mxu1 %v398_v14  ;;  %v449_v9 = vld [vmem:[#allocation2 + $0x290] sm:$0xff]  ;;  %v452_v10 = vld [vmem:[#allocation2 + $0x2a8] sm:$0xff]  ;;  %v454_v11 = vld [vmem:[#allocation2 + $0x2b8] sm:$0xff] }
 0x136   :  { %v451_v12 = vld [vmem:[#allocation2 + $0x2a0] sm:$0xff]  ;;  %v453_v13 = vld [vmem:[#allocation2 + $0x2b0] sm:$0xff]  ;;  %v456_v14 = vld [vmem:[#allocation2 + $0x2c8] sm:$0xff] }
 0x138   :  { %547 = vmatpush1.bf16.msra.mxu0 %v395_v15  ;;  %629 = vmatpush1.bf16.msra.mxu1 %v397_v16  ;;  %v458_v15 = vld [vmem:[#allocation2 + $0x2d8] sm:$0xff]  ;;  %v455_v16 = vld [vmem:[#allocation2 + $0x2c0] sm:$0xff] }
 0x139   :  { %548 = vmatprep.subr.bf16.mxu0 %v400_v17  ;;  %630 = vmatprep.subr.bf16.mxu1 %v402_v18  ;;  %v457_v17 = vld [vmem:[#allocation2 + $0x2d0] sm:$0xff]  ;;  %v460_v18 = vld [vmem:[#allocation2 + $0x2e8] sm:$0xff] }
 0x13c   :  { %549 = vmatpush1.bf16.msra.mxu0 %v399_v19  ;;  %631 = vmatpush1.bf16.msra.mxu1 %v401_v20  ;;  %v462_v19 = vld [vmem:[#allocation2 + $0x2f8] sm:$0xff]  ;;  %v459_v20 = vld [vmem:[#allocation2 + $0x2e0] sm:$0xff] }
 0x13d   :  { %550 = vmatprep.subr.bf16.mxu0 %v404_v21  ;;  %632 = vmatprep.subr.bf16.mxu1 %v406_v22  ;;  %v461_v21 = vld [vmem:[#allocation2 + $0x2f0] sm:$0xff]  ;;  %v464_v22 = vld [vmem:[#allocation2 + $0x308] sm:$0xff] }
 0x140   :  { %551 = vmatpush1.bf16.msra.mxu0 %v403_v23  ;;  %633 = vmatpush1.bf16.msra.mxu1 %v405_v24  ;;  %v466_v23 = vld [vmem:[#allocation2 + $0x318] sm:$0xff]  ;;  %v463_v24 = vld [vmem:[#allocation2 + $0x300] sm:$0xff] }
 0x141   :  { %552 = vmatprep.subr.bf16.mxu0 %v408_v25  ;;  %634 = vmatprep.subr.bf16.mxu1 %v410_v26  ;;  %v465_v25 = vld [vmem:[#allocation2 + $0x310] sm:$0xff]  ;;  %v468_v26 = vld [vmem:[#allocation2 + $0x328] sm:$0xff] }
 0x144   :  { %553 = vmatpush1.bf16.msra.mxu0 %v407_v27  ;;  %635 = vmatpush1.bf16.msra.mxu1 %v409_v28  ;;  %v470_v27 = vld [vmem:[#allocation2 + $0x338] sm:$0xff]  ;;  %v467_v28 = vld [vmem:[#allocation2 + $0x320] sm:$0xff] }
 0x145   :  { %554 = vmatprep.subr.bf16.mxu0 %v412_v29  ;;  %636 = vmatprep.subr.bf16.mxu1 %v414_v30  ;;  %v469_v29 = vld [vmem:[#allocation2 + $0x330] sm:$0xff]  ;;  %v472_v30 = vld [vmem:[#allocation2 + $0x348] sm:$0xff] }
 0x148   :  { %555 = vmatpush1.bf16.msra.mxu0 %v411_v31  ;;  %637 = vmatpush1.bf16.msra.mxu1 %v413_v32  ;;  %v474_v31 = vld [vmem:[#allocation2 + $0x358] sm:$0xff]  ;;  %v471_v32 = vld [vmem:[#allocation2 + $0x340] sm:$0xff] }
 0x149   :  { %556 = vmatprep.subr.bf16.mxu0 %v416_v33  ;;  %638 = vmatprep.subr.bf16.mxu1 %v418_v34  ;;  %v473_v33 = vld [vmem:[#allocation2 + $0x350] sm:$0xff]  ;;  %v476_v34 = vld [vmem:[#allocation2 + $0x368] sm:$0xff] }
 0x14c   :  { %557 = vmatpush1.bf16.msra.mxu0 %v415_v38  ;;  %639 = vmatpush1.bf16.msra.mxu1 %v417_v40  ;;  %v478_v38 = vld [vmem:[#allocation2 + $0x378] sm:$0xff]  ;;  %v475_v40 = vld [vmem:[#allocation2 + $0x360] sm:$0xff] }
 0x14d   :  { %558 = vmatprep.subr.bf16.mxu0 %v420_v42  ;;  %640 = vmatprep.subr.bf16.mxu1 %v422_v44  ;;  %v477_v42 = vld [vmem:[#allocation2 + $0x370] sm:$0xff]  ;;  %v480_v44 = vld [vmem:[#allocation2 + $0x388] sm:$0xff] }
 0x150   :  { %559 = vmatpush1.bf16.msra.mxu0 %v419_v45  ;;  %641 = vmatpush1.bf16.msra.mxu1 %v421_v46  ;;  %v482_v45 = vld [vmem:[#allocation2 + $0x398] sm:$0xff]  ;;  %v479_v46 = vld [vmem:[#allocation2 + $0x380] sm:$0xff] }
 0x151   :  { %560 = vmatprep.subr.bf16.mxu0 %v424_v47  ;;  %642 = vmatprep.subr.bf16.mxu1 %v426_v48  ;;  %v481_v47 = vld [vmem:[#allocation2 + $0x390] sm:$0xff]  ;;  %v484_v48 = vld [vmem:[#allocation2 + $0x3a8] sm:$0xff] }
 0x154   :  { %561 = vmatpush1.bf16.msra.mxu0 %v423_v49  ;;  %643 = vmatpush1.bf16.msra.mxu1 %v425_v50  ;;  %v486_v49 = vld [vmem:[#allocation2 + $0x3b8] sm:$0xff]  ;;  %v483_v50 = vld [vmem:[#allocation2 + $0x3a0] sm:$0xff] }
 0x155   :  { %562 = vmatprep.subr.bf16.mxu0 %v428_v51  ;;  %644 = vmatprep.subr.bf16.mxu1 %v430_v52  ;;  %v485_v51 = vld [vmem:[#allocation2 + $0x3b0] sm:$0xff]  ;;  %v488_v52 = vld [vmem:[#allocation2 + $0x3c8] sm:$0xff] }
 0x158   :  { %563 = vmatpush1.bf16.msra.mxu0 %v427_v53  ;;  %645 = vmatpush1.bf16.msra.mxu1 %v429_v54  ;;  %v490_v53 = vld [vmem:[#allocation2 + $0x3d8] sm:$0xff]  ;;  %v487_v54 = vld [vmem:[#allocation2 + $0x3c0] sm:$0xff] }
 0x159   :  { %573 = vmatprep.subr.bf16.mxu0 %v432_v55  ;;  %655 = vmatprep.subr.bf16.mxu1 %v434_v56  ;;  %v489_v55 = vld [vmem:[#allocation2 + $0x3d0] sm:$0xff]  ;;  %v492_v56 = vld [vmem:[#allocation2 + $0x3e8] sm:$0xff] }
 0x15b   :  { %565 = vmatmul.mubr.bf16.vlgmr.msra.gmra.mrb[4].mxu0 %v363_v57  ;;  %647 = vmatmul.mubr.bf16.vlgmr.msra.gmra.mrb[4].mxu1 %v363_v57  ;;  %v494_v57 = vld [vmem:[#allocation2 + $0x3f8] sm:$0xff] }
 0x15c   :  { %574 = vmatpush1.bf16.msra.mxu0 %v431_v58  ;;  %656 = vmatpush1.bf16.msra.mxu1 %v433_v59  ;;  %v491_v58 = vld [vmem:[#allocation2 + $0x3e0] sm:$0xff]  ;;  %v493_v59 = vld [vmem:[#allocation2 + $0x3f0] sm:$0xff] }
 0x15d   :  { %575 = vmatprep.subr.bf16.mxu0 %v436_v60  ;;  %657 = vmatprep.subr.bf16.mxu1 %v438_v61  ;;  %v365_v60 = vpack.c.bf16 %v356_v39, %v356_v39  ;;  %v496_v61 = vlaneseq }
 0x15e   :  { %605 = vmatprep.mubr.bf16.mxu0 %v366_v62  ;;  %687 = vmatprep.mubr.bf16.mxu1 %v366_v62 }
 0x15f   :  { %v1188_v62 = vshrl.u32 %v496_v61, 7 }
 0x160   :  { %576 = vmatpush1.bf16.msra.mxu0 %v435_v35  ;;  %658 = vmatpush1.bf16.msra.mxu1 %v437_v36 }
 0x161   :  { %577 = vmatprep.subr.bf16.mxu0 %v440_v63  ;;  %659 = vmatprep.subr.bf16.mxu1 %v442_v0  ;;  %v498_v35 = vsub.s32 0, %v1188_v62  ;;  %v506_v36 = vsub.s32 4, %v1188_v62  ;;  %v502_v63 = vsub.s32 2, %v1188_v62  ;;  %v510_v0 = vsub.s32 6, %v1188_v62 }
 0x163   :  { %v507_v37 = vrot.slane %v1153_v1, %v506_v36  ;;  %v503_v39 = vrot.slane %v1153_v1, %v502_v63 }
 0x164   :  { %578 = vmatpush1.bf16.msra.mxu0 %v439_v2  ;;  %660 = vmatpush1.bf16.msra.mxu1 %v441_v41  ;;  %v499_v2 = vrot.slane %v1153_v1, %v498_v35  ;;  %v511_v41 = vrot.slane %v1153_v1, %v510_v0 }
 0x165   :  { %579 = vmatprep.subr.bf16.mxu0 %v444_v3  ;;  %661 = vmatprep.subr.bf16.mxu1 %v446_v43  ;;  %v527_v43 = vrot.slane %v507_v37, %v498_v35 }
 0x166   :  { %v519_v3 = vrot.slane %v499_v2, %v498_v35 }
 0x168   :  { %580 = vmatpush1.bf16.msra.mxu0 %v443_v4  ;;  %662 = vmatpush1.bf16.msra.mxu1 %v445_v5  ;;  %v523_v4 = vrot.slane %v503_v39, %v498_v35  ;;  %v531_v5 = vrot.slane %v511_v41, %v498_v35 }
 0x169   :  { %581 = vmatprep.subr.bf16.mxu0 %v448_v6  ;;  %663 = vmatprep.subr.bf16.mxu1 %v450_v7 }
 0x16c   :  { %582 = vmatpush1.bf16.msra.mxu0 %v447_v8  ;;  %664 = vmatpush1.bf16.msra.mxu1 %v449_v9 }
 0x16d   :  { %583 = vmatprep.subr.bf16.mxu0 %v452_v10  ;;  %665 = vmatprep.subr.bf16.mxu1 %v454_v11 }
 0x170   :  { %584 = vmatpush1.bf16.msra.mxu0 %v451_v12  ;;  %666 = vmatpush1.bf16.msra.mxu1 %v453_v13 }
 0x171   :  { %585 = vmatprep.subr.bf16.mxu0 %v456_v14  ;;  %667 = vmatprep.subr.bf16.mxu1 %v458_v15 }
 0x174   :  { %586 = vmatpush1.bf16.msra.mxu0 %v455_v16  ;;  %668 = vmatpush1.bf16.msra.mxu1 %v457_v17 }
 0x175   :  { %587 = vmatprep.subr.bf16.mxu0 %v460_v18  ;;  %669 = vmatprep.subr.bf16.mxu1 %v462_v19 }
 0x178   :  { %588 = vmatpush1.bf16.msra.mxu0 %v459_v20  ;;  %670 = vmatpush1.bf16.msra.mxu1 %v461_v21 }
 0x179   :  { %589 = vmatprep.subr.bf16.mxu0 %v464_v22  ;;  %671 = vmatprep.subr.bf16.mxu1 %v466_v23 }
 0x17c   :  { %590 = vmatpush1.bf16.msra.mxu0 %v463_v24  ;;  %672 = vmatpush1.bf16.msra.mxu1 %v465_v25 }
 0x17d   :  { %591 = vmatprep.subr.bf16.mxu0 %v468_v26  ;;  %673 = vmatprep.subr.bf16.mxu1 %v470_v27 }
 0x180   :  { %592 = vmatpush1.bf16.msra.mxu0 %v467_v28  ;;  %674 = vmatpush1.bf16.msra.mxu1 %v469_v29 }
 0x181   :  { %593 = vmatprep.subr.bf16.mxu0 %v472_v30  ;;  %675 = vmatprep.subr.bf16.mxu1 %v474_v31 }
 0x184   :  { %594 = vmatpush1.bf16.msra.mxu0 %v471_v32  ;;  %676 = vmatpush1.bf16.msra.mxu1 %v473_v33 }
 0x185   :  { %595 = vmatprep.subr.bf16.mxu0 %v476_v34  ;;  %677 = vmatprep.subr.bf16.mxu1 %v478_v38 }
 0x188   :  { %596 = vmatpush1.bf16.msra.mxu0 %v475_v40  ;;  %678 = vmatpush1.bf16.msra.mxu1 %v477_v42 }
 0x189   :  { %597 = vmatprep.subr.bf16.mxu0 %v480_v44  ;;  %679 = vmatprep.subr.bf16.mxu1 %v482_v45 }
 0x18c   :  { %598 = vmatpush1.bf16.msra.mxu0 %v479_v46  ;;  %680 = vmatpush1.bf16.msra.mxu1 %v481_v47 }
 0x18d   :  { %599 = vmatprep.subr.bf16.mxu0 %v484_v48  ;;  %681 = vmatprep.subr.bf16.mxu1 %v486_v49 }
 0x190   :  { %600 = vmatpush1.bf16.msra.mxu0 %v483_v50  ;;  %682 = vmatpush1.bf16.msra.mxu1 %v485_v51 }
 0x191   :  { %601 = vmatprep.subr.bf16.mxu0 %v488_v52  ;;  %683 = vmatprep.subr.bf16.mxu1 %v490_v53 }
 0x194   :  { %602 = vmatpush1.bf16.msra.mxu0 %v487_v54  ;;  %684 = vmatpush1.bf16.msra.mxu1 %v489_v55 }
 0x195   :  { %603 = vmatprep.subr.bf16.mxu0 %v492_v56  ;;  %685 = vmatprep.subr.bf16.mxu1 %v494_v57 }
 0x198   :  { %604 = vmatpush1.bf16.msra.mxu0 %v491_v58  ;;  %686 = vmatpush1.bf16.msra.mxu1 %v493_v59 }
 0x19b   :  { %606 = vmatmul.mubr.bf16.vlgmr.msra.gmra.mrb[4].mxu0 %v365_v60  ;;  %688 = vmatmul.mubr.bf16.vlgmr.msra.gmra.mrb[4].mxu1 %v365_v60 }
 0x26e   :  { %v607_v6 = vpop.f32.mrb[4].mxu0  ;;  %v689_v7 = vpop.f32.mrb[4].mxu1 }
 0x26f   :  { %v1198_v8 = vadd.f32 %v607_v6, %v519_v3  ;;  %v1200_v9 = vadd.f32 %v689_v7, %v527_v43  ;;  %v609_v10 = vpop.f32.mrb[5].mxu0  ;;  %v691_v11 = vpop.f32.mrb[5].mxu1 }
 0x270   :  { %v940_v12 = vadd.f32 %v609_v10, %v523_v4  ;;  %v942_v13 = vadd.f32 %v691_v11, %v531_v5  ;;  %v611_v14 = vpop.f32.mrb[6].mxu0  ;;  %v693_v15 = vpop.f32.mrb[6].mxu1 }
 0x271   :  { %v696_v16 = vmax.f32 %v1198_v8, 0.0  ;;  %v698_v17 = vmax.f32 %v1200_v9, 0.0  ;;  %v612_v18 = vpop.f32.mrb[7].mxu0  ;;  %v694_v19 = vpop.f32.mrb[7].mxu1 }
 0x272   :  { %v697_v20 = vmax.f32 %v940_v12, 0.0  ;;  %v699_v21 = vmax.f32 %v942_v13, 0.0 }
 0x273   :  { %1087 = dma.done.wait [#allocation4 + $0x1], 4096 }
 0x274   :  { %1088 = vsyncadd [#allocation4 + $0x1], 4294963200  ;;  %v704_v22 = vpack.c.bf16 %v697_v20, %v697_v20  ;;  %v706_v23 = vpack.c.bf16 %v699_v21, %v699_v21  ;;  %v715_v24 = vld [vmem:[#allocation3 + $0x40] sm:$0xff]  ;;  %v716_v28 = vld [vmem:[#allocation3 + $0x48] sm:$0xff]  ;;  %v703_v35 = vpack.c.bf16 %v696_v16, %v696_v16  ;;  %v705_v36 = vpack.c.bf16 %v698_v17, %v698_v17  ;;  %s1104_s4 = smov [#allocation8]  }
 0x275   :  { %v731_v25 = vld [vmem:[#allocation3 + $0xc0] sm:$0xff]  ;;  %895 = vmatprep.subr.bf16.mxu0 %v715_v24  ;;  %v732_v29 = vld [vmem:[#allocation3 + $0xc8] sm:$0xff]  ;;  %v717_v32 = vld [vmem:[#allocation3 + $0x50] sm:$0xff]  ;;  %v741_v63 = vsub.s32 1, %v1188_v62  ;;  %s836_s8 = sshll.u32 %s1104_s4, 4  ;;  %s837_s8 = int_to_ptr.vmem [resolvable:$true] %s836_s8 }
 0x276   :  { %775 = vmatprep.mubr.bf16.mxu0 %v704_v22  ;;  %815 = vmatprep.mubr.bf16.mxu1 %v706_v23  ;;  %v707_v26 = vld [vmem:[#allocation3] sm:$0xff]  ;;  %v708_v30 = vld [vmem:[#allocation3 + $0x8] sm:$0xff]  ;;  %v733_v33 = vld [vmem:[#allocation3 + $0xd0] sm:$0xff]  ;;  %s1061_s9 = scalar_lea.vmem %s837_s8, 128  ;;  %p1066_p3 = scmp.lt.s32.totalorder %s837_s8, %s837_s8 }
 0x277   :  { %917 = vmatprep.subr.bf16.mxu1 %v731_v25  ;;  %v723_v27 = vld [vmem:[#allocation3 + $0x80] sm:$0xff]  ;;  %896 = vmatpush3.bf16.msra.mxu0 %v707_v26  ;;  %v724_v31 = vld [vmem:[#allocation3 + $0x88] sm:$0xff]  ;;  %v709_v34 = vld [vmem:[#allocation3 + $0x10] sm:$0xff]  ;;  %v742_v37 = vrot.slane %v1153_v1, %v741_v63  ;;  %p1062_p2 = scmp.ne.s32.totalorder %s837_s8, %s1061_s9  ;;  %p1067_p4 = scmp.lt.s32.totalorder %s1061_s9, %s1061_s9 }
 0x278   :  { %918 = vmatpush3.bf16.msra.mxu1 %v723_v27  ;;  %897 = vmatprep.subr.bf16.mxu0 %v716_v28  ;;  %v725_v38 = vld [vmem:[#allocation3 + $0x90] sm:$0xff]  ;;  %v718_v40 = vld [vmem:[#allocation3 + $0x58] sm:$0xff]  ;;  %v719_v46 = vld [vmem:[#allocation3 + $0x60] sm:$0xff] }
 0x279   :  { %919 = vmatprep.subr.bf16.mxu1 %v732_v29  ;;  %v734_v42 = vld [vmem:[#allocation3 + $0xd8] sm:$0xff]  ;;  %v735_v47 = vld [vmem:[#allocation3 + $0xe0] sm:$0xff]  ;;  %v720_v50 = vld [vmem:[#allocation3 + $0x68] sm:$0xff]  ;;  %p1068_p5 = por %p1067_p4, %p1066_p3 }
 0x27a   :  { %v710_v44 = vld [vmem:[#allocation3 + $0x18] sm:$0xff]  ;;  %v711_v48 = vld [vmem:[#allocation3 + $0x20] sm:$0xff]  ;;  %v736_v51 = vld [vmem:[#allocation3 + $0xe8] sm:$0xff] }
 0x27b   :  { %898 = vmatpush3.bf16.msra.mxu0 %v708_v30  ;;  %v726_v45 = vld [vmem:[#allocation3 + $0x98] sm:$0xff]  ;;  %v727_v49 = vld [vmem:[#allocation3 + $0xa0] sm:$0xff]  ;;  %v712_v52 = vld [vmem:[#allocation3 + $0x28] sm:$0xff]  ;;  %p1069_p6 = pnand %p1068_p5, %p1062_p2 }
 0x27c   :  { %920 = vmatpush3.bf16.msra.mxu1 %v724_v31  ;;  %899 = vmatprep.subr.bf16.mxu0 %v717_v32  ;;  %v728_v53 = vld [vmem:[#allocation3 + $0xa8] sm:$0xff]  ;;  %v721_v54 = vld [vmem:[#allocation3 + $0x70] sm:$0xff]  ;;  %v722_v58 = vld [vmem:[#allocation3 + $0x78] sm:$0xff] }
 0x27d   :  { %921 = vmatprep.subr.bf16.mxu1 %v733_v33  ;;  %v737_v55 = vld [vmem:[#allocation3 + $0xf0] sm:$0xff]  ;;  %v738_v59 = vld [vmem:[#allocation3 + $0xf8] sm:$0xff] }
 0x27e   :  { %v713_v56 = vld [vmem:[#allocation3 + $0x30] sm:$0xff]  ;;  %v714_v60 = vld [vmem:[#allocation3 + $0x38] sm:$0xff] }
 0x27f   :  { %900 = vmatpush3.bf16.msra.mxu0 %v709_v34  ;;  %v729_v57 = vld [vmem:[#allocation3 + $0xb0] sm:$0xff]  ;;  %v730_v61 = vld [vmem:[#allocation3 + $0xb8] sm:$0xff] }
 0x280   :  { %922 = vmatpush3.bf16.msra.mxu1 %v725_v38  ;;  %901 = vmatprep.subr.bf16.mxu0 %v718_v40 }
 0x281   :  { %923 = vmatprep.subr.bf16.mxu1 %v734_v42 }
 0x283   :  { %902 = vmatpush3.bf16.msra.mxu0 %v710_v44 }
 0x284   :  { %924 = vmatpush3.bf16.msra.mxu1 %v726_v45  ;;  %903 = vmatprep.subr.bf16.mxu0 %v719_v46 }
 0x285   :  { %925 = vmatprep.subr.bf16.mxu1 %v735_v47 }
 0x287   :  { %904 = vmatpush3.bf16.msra.mxu0 %v711_v48 }
 0x288   :  { %926 = vmatpush3.bf16.msra.mxu1 %v727_v49  ;;  %905 = vmatprep.subr.bf16.mxu0 %v720_v50 }
 0x289   :  { %927 = vmatprep.subr.bf16.mxu1 %v736_v51 }
 0x28b   :  { %906 = vmatpush3.bf16.msra.mxu0 %v712_v52 }
 0x28c   :  { %928 = vmatpush3.bf16.msra.mxu1 %v728_v53  ;;  %907 = vmatprep.subr.bf16.mxu0 %v721_v54 }
 0x28d   :  { %929 = vmatprep.subr.bf16.mxu1 %v737_v55 }
 0x28f   :  { %908 = vmatpush3.bf16.msra.mxu0 %v713_v56 }
 0x290   :  { %930 = vmatpush3.bf16.msra.mxu1 %v729_v57  ;;  %909 = vmatprep.subr.bf16.mxu0 %v722_v58 }
 0x291   :  { %931 = vmatprep.subr.bf16.mxu1 %v738_v59 }
 0x293   :  { %910 = vmatpush3.bf16.msra.mxu0 %v714_v60 }
 0x294   :  { %932 = vmatpush3.bf16.msra.mxu1 %v730_v61 }
 0x296   :  { %776 = vmatmul.mubr.bf16.vlgmr.msra.gmra.mrb[8].mxu0 %v703_v35 }
 0x297   :  { %816 = vmatmul.mubr.bf16.vlgmr.msra.gmra.mrb[8].mxu1 %v705_v36 }
 0x369   :  { %v911_v0 = vpop.f32.mrb[8].mxu0 }
 0x36a   :  { %v933_v2 = vpop.f32.mrb[8].mxu1  ;;  %v912_v39 = vpop.f32.mrb[9].mxu0 }
 0x36b   :  { %v934_v41 = vpop.f32.mrb[9].mxu1  ;;  %v913_v3 = vadd.f32 %v912_v39, %v911_v0  ;;  %v914_v4 = vpop.f32.mrb[10].mxu0 }
 0x36c   :  { %v935_v43 = vadd.f32 %v934_v41, %v933_v2  ;;  %v936_v5 = vpop.f32.mrb[10].mxu1  ;;  %v915_v6 = vpop.f32.mrb[11].mxu0 }
 0x36d   :  { %v937_v7 = vpop.f32.mrb[11].mxu1  ;;  %v778_v8 = vadd.f32 %v913_v3, %v742_v37 }
 0x36f   :  { %v818_v9 = vadd.f32 %v935_v43, %v778_v8 }
 0x371   :  { %v892_v10 = vmul.f32 -1.442695, %v818_v9 }
 0x373   :  { %1013 = vpow2.f32 %v892_v10 }
 0x37d   :  { %v1014_v11 = vpop.eup %1013 }
 0x37e   :  { %v826_v12 = vadd.f32 1.0, %v1014_v11 }
 0x380   :  { %1015 = vrcp.f32 %v826_v12 }
 0x38a   :  { %v1016_v62 = vpop.eup %1015 }
 0x38b   :  { %829 = vst [vmem:[#allocation8] sm:$0xff] %v1016_v62 }
 0x38c   :  { %1072 = shalt.err (!%p1069_p6)
}
 0x38d   :  { %s1073_s12 = scalar_lea.hbm %s1229_s5, 128 }
 0x38e   :  { %p1074_p7 = scmp.ne.s32.totalorder %s1229_s5, %s1073_s12  ;;  %p1077_p8 = scmp.lt.u32.totalorder %s1073_s12, %s1229_s5 }
 0x390   :  { %p1079_p9 = pnand %p1077_p8, %p1074_p7 }
 0x392   :  { %1082 = shalt.err (!%p1079_p9)
}
 0x393   :  { %839 = dma.vmem_to_hbm [thread:$0]  %s837_s8, 128, %s1229_s5, [#allocation7]  }
 0x394   :  { %1089 = dma.done.wait [#allocation7], 128  }
 0x395   :  { %1090 = vsyncadd [#allocation7], 4294967168 }
 0x396   :  { %843 = vsyncpa [#allocation6], 1 }
 0x397   :  { %844 = vsyncpa [#allocation7], 1 }
 0x398   :  { %845 = vsyncmov [#allocation4] }
 0x39b   :  { %s846_s18 = vpop.sfrf %845 }
 0x39c   :  { %p893_p10 = scmp.ne.s32.totalorder %s846_s18, 0 }
 0x39e   :  { %850 = shalt.err (%p893_p10)  }
 0x39f   :  { %852 = vsyncmov [#allocation4 + $0x1] }
 0x3a2   :  { %s853_s19 = vpop.sfrf %852 }
 0x3a3   :  { %p894_p11 = scmp.ne.s32.totalorder %s853_s19, 0 }
 0x3a5   :  { %857 = shalt.err (%p894_p11)  }

</bundles_post_ra>
